<compile_context>
chip_gen: v6e
topology: v6e:2x2x1
jax: 0.10.0
libtpu: 0.0.40
codegen_flags: <defaults>
</compile_context>

<pallas_src>
import jax
import jax.numpy as jnp
from jax.experimental import pallas as pl
from jax.experimental.pallas import tpu as pltpu


def _identity_dma_kernel(mem_hbm_ref, out_hbm_ref, copy_sem):
    # Single HBM->HBM DMA of the whole tensor: no HBM->VMEM->vreg->VMEM->HBM
    # round trip, zero VMEM footprint, zero TensorCore work.
    # (For multi-GiB tensors this could be chunked via .at[...] over the
    # leading axis with a small semaphore array, but a single descriptor is
    # already optimal for a plain memcpy.)
    cp = pltpu.make_async_copy(mem_hbm_ref, out_hbm_ref, copy_sem)
    cp.start()
    cp.wait()


def dummy_decoder_forward(tgt, memory, tgt_mask=None, memory_mask=None,
                          tgt_key_padding_mask=None,
                          memory_key_padding_mask=None, **_):
    """DummyDecoder.forward: ignores everything except `memory`, returns it."""
    del tgt, tgt_mask, memory_mask, tgt_key_padding_mask, memory_key_padding_mask

    nbytes = int(memory.size) * jnp.dtype(memory.dtype).itemsize
    return pl.pallas_call(
        _identity_dma_kernel,
        out_shape=jax.ShapeDtypeStruct(memory.shape, memory.dtype),
        in_specs=[pl.BlockSpec(memory_space=pl.ANY)],    # raw HBM ref, no auto-DMA
        out_specs=pl.BlockSpec(memory_space=pl.ANY),     # raw HBM ref, no auto-DMA
        scratch_shapes=[pltpu.SemaphoreType.DMA],        # DMA-completion semaphore
        cost_estimate=pl.CostEstimate(
            flops=0, transcendentals=0,
            bytes_accessed=2 * nbytes),                  # exact: read + write once
    )(memory)


if __name__ == "__main__":
    key = jax.random.PRNGKey(0)
    k_tgt, k_mem = jax.random.split(key)

    # Small shapes consistent with a (seq, batch, hidden) transformer stack.
    S, N, E = 8, 2, 32
    tgt = jax.random.normal(k_tgt, (S, N, E), dtype=jnp.float32)
    memory = jax.random.normal(k_mem, (S, N, E), dtype=jnp.float32)

    out = dummy_decoder_forward(
        tgt, memory,
        tgt_mask=None, memory_mask=None,
        tgt_key_padding_mask=None, memory_key_padding_mask=None,
    )
    out = jax.block_until_ready(out)

    assert out.shape == memory.shape and out.dtype == memory.dtype
    assert bool(jnp.array_equal(out, memory))

    print("KERNEL_OK")
</pallas_src>

<mosaic_0001>
module attributes {stable_mosaic.version = 11 : i64} {
  func.func @_identity_dma_kernel(%arg0: memref<8x2x32xf32, #tpu.memory_space<any>>, %arg1: memref<8x2x32xf32, #tpu.memory_space<any>>, %arg2: memref<!tpu.dma_semaphore, #tpu.memory_space<semaphore_mem>>) attributes {dimension_semantics = [], scalar_prefetch = 0 : i64, scratch_operands = 1 : i64, tpu.core_type = #tpu.core_type<tc>} {
    tpu.enqueue_dma source(%arg0 : memref<8x2x32xf32, #tpu.memory_space<any>>) target(%arg1 : memref<8x2x32xf32, #tpu.memory_space<any>>) target_semaphore(%arg2 : memref<!tpu.dma_semaphore, #tpu.memory_space<semaphore_mem>>)
    tpu.wait_dma2 semaphore(%arg2 : memref<!tpu.dma_semaphore, #tpu.memory_space<semaphore_mem>>) src(%arg0 : memref<8x2x32xf32, #tpu.memory_space<any>>) dst(%arg1 : memref<8x2x32xf32, #tpu.memory_space<any>>)
    return
  }
}

</mosaic_0001>

<bundles_post_ra>
// kernel: tpu_custom_call.1
= control target key start
LH: loop header
LB: loop body
LE: loop exit
PB: predicated region body
PF: predicated region fallthrough
CT: control target
= control target key end

     0   :  { %s29_s6 = smov [#allocation2]   ;;  %s30_s7 = smov 131072   ;;  %s48_s0 = inlined_call_operand.hbm [shape: f32[8,2,32], index: 0, kind: input, shape index: {}]   ;;  %s49_s1 = inlined_call_operand.hbm [shape: f32[8,2,32], index: 1, kind: output, shape index: {}]  }
   0x1   :  { %s31_s8 = smov 0  }
   0x2   :  { %12 = dma.general %s48_s0, 256, %s49_s1, %s29_s6, %s30_s7, [#allocation4], %s31_s8, 0  }
   0x3   :  { %27 = dma.done.wait [#allocation2], 256 }
   0x4   :  { %28 = vsyncadd [#allocation2], 4294967040 }
   0x5   :  { %17 = vsyncmov [#allocation2] }
   0x8   :  { %s18_s13 = vpop.sfrf %17 }
   0x9   :  { %p23_p0 = scmp.ne.s32.totalorder %s18_s13, 0 }
   0xb   :  { %22 = shalt.err (%p23_p0)  }

</bundles_post_ra>
